<compile_context>
chip_gen: v5e
topology: v5e:2x2
jax: 0.10.0
libtpu: 0.0.40
codegen_flags: <defaults>
</compile_context>

<pallas_src>
import functools

import jax
import jax.numpy as jnp
from jax import lax
from jax.experimental import pallas as pl
from jax.experimental.pallas import tpu as pltpu

_LANE = 128
_SUBLANE = 8


def _round_up(x, m):
    return ((x + m - 1) // m) * m


def _recall_counts_kernel(yhat_ref, y_ref, out_ref, *, in_class, num_classes,
                          rows, block_rows):
    # yhat_ref: (C, R, 128) logits (native dtype, full-sublane tiles)
    # y_ref:    (R, 128)    labels (native dtype)
    # out_ref:  (1, 2)      int32 in SMEM -> this tile's [TP, POS]
    is_pos = y_ref[...] == jnp.asarray(in_class, dtype=y_ref.dtype)   # (R,128)

    if rows % block_rows != 0:
        # Trailing grid block only partially covers the array; rows past the
        # valid range hold undefined data.  ANDing the validity mask into
        # is_pos gates both the TP and POS counts.
        t = pl.program_id(1)
        row_ids = t * block_rows + lax.broadcasted_iota(jnp.int32,
                                                        is_pos.shape, 0)
        is_pos = jnp.logical_and(is_pos, row_ids < rows)

    pos = jnp.sum(is_pos.astype(jnp.int32))

    if in_class == 0:
        # torch: preds[preds != 0] = 0 zeroes everything -> TP = sum(y == 0).
        tp = pos
    elif 0 < in_class < num_classes:
        target = yhat_ref[in_class]                       # (R,128) whole-vreg view
        pred_is_class = None
        for c in range(num_classes):                      # unrolled, VPU only
            if c == in_class:
                continue
            row = yhat_ref[c]
            # earlier channel wins ties -> must be strictly greater than them
            cmp = (target > row) if c < in_class else (target >= row)
            pred_is_class = cmp if pred_is_class is None else \
                jnp.logical_and(pred_is_class, cmp)
        tp = jnp.sum(jnp.logical_and(pred_is_class, is_pos).astype(jnp.int32))
    else:
        # in_class outside [0, C): argmax can never equal it -> TP = 0.
        tp = jnp.int32(0)

    out_ref[0, 0] = tp
    out_ref[0, 1] = pos


def _choose_block_rows(rows, num_classes, itemsize, batch):
    target_bytes = 2 * 1024 * 1024                 # ~2 MiB of yhat per block
    r = target_bytes // (num_classes * _LANE * itemsize)
    r = max(_SUBLANE, (r // _SUBLANE) * _SUBLANE)
    if rows > _SUBLANE:
        # v7x shards "parallel" grid axes across 2 TensorCores -- expose at
        # least ~8 grid cells (when the problem is big enough) so neither idles.
        tiles_per_sample = max(1, -(-8 // max(1, batch)))
        r_split = _round_up(-(-rows // tiles_per_sample), _SUBLANE)
        r = min(r, r_split)
    if r >= rows:
        return rows                                 # full-extent block (always legal)
    return max(_SUBLANE, (r // _SUBLANE) * _SUBLANE)


def recall_class1(yhat, y, in_class=1, eps=1e-6, block_rows=None):
    """yhat: (N, C, H, W) float logits; y: (N, H, W) integer labels.

    Returns a float32 scalar recall.
    TODO(synk): PyTorch returns a host python float via .cpu().numpy().item();
    here a JAX scalar is returned (caller can float(...) it).
    """
    N, C, H, W = yhat.shape
    HW = H * W

    if HW % _LANE != 0:
        # Rare path (spatial size not a multiple of 128): pad once so the free
        # (rows, 128) fold below is possible.  Pad labels with a value that can
        # never equal in_class so the extra pixels are ignored by TP and POS.
        # TODO(synk): could use lane-level tail masking to avoid this extra HBM
        # pass; not needed for typical segmentation resolutions.
        HW_pad = _round_up(HW, _LANE)
        pad_label = 0 if in_class != 0 else 1
        yhat = jnp.pad(yhat.reshape(N, C, HW),
                       ((0, 0), (0, 0), (0, HW_pad - HW)))
        y = jnp.pad(y.reshape(N, HW), ((0, 0), (0, HW_pad - HW)),
                    constant_values=pad_label)
        HW = HW_pad

    rows = HW // _LANE
    # Free reshapes only (no NCHW->NHWC transpose, no dtype widening of y).
    yh = yhat.reshape(N, C, rows, _LANE)
    yv = y.reshape(N, rows, _LANE)

    if block_rows is None:
        block_rows = _choose_block_rows(rows, C, yh.dtype.itemsize, N)
    block_rows = min(block_rows, rows)
    if block_rows < rows:
        block_rows = max(_SUBLANE, (block_rows // _SUBLANE) * _SUBLANE)
    n_tiles = pl.cdiv(rows, block_rows)

    kernel = functools.partial(_recall_counts_kernel, in_class=in_class,
                               num_classes=C, rows=rows, block_rows=block_rows)

    # Per-tile [TP, POS] partials (int32, exact); tiny reduction done outside.
    partials = pl.pallas_call(
        kernel,
        out_shape=jax.ShapeDtypeStruct((N, n_tiles, 2), jnp.int32),
        grid_spec=pltpu.PrefetchScalarGridSpec(
            num_scalar_prefetch=0,
            grid=(N, n_tiles),
            in_specs=[
                pl.BlockSpec((None, C, block_rows, _LANE),
                             lambda n, t: (n, 0, t, 0)),
                pl.BlockSpec((None, block_rows, _LANE),
                             lambda n, t: (n, t, 0)),
            ],
            out_specs=pl.BlockSpec((None, 1, 2), lambda n, t: (n, t, 0),
                                   memory_space=pltpu.SMEM),
        ),
        compiler_params=pltpu.CompilerParams(
            dimension_semantics=("parallel", "parallel")),
    )(yh, yv)

    tp = jnp.sum(partials[:, :, 0]).astype(jnp.float32)
    pos = jnp.sum(partials[:, :, 1]).astype(jnp.float32)
    fn = pos if in_class == 0 else pos - tp
    return tp / (tp + fn + jnp.float32(eps))


def _torch_like_reference(yhat, y, in_class=1, eps=1e-6):
    probs = jax.nn.softmax(yhat, axis=1)
    preds = jnp.argmax(probs, axis=1)
    preds = jnp.where(preds != in_class, 0, preds)
    tp = jnp.sum((preds == in_class) & (y == in_class))
    fn = jnp.sum((preds == 0) & (y == in_class))
    return tp / (tp + fn + eps)


if __name__ == "__main__":
    key = jax.random.PRNGKey(0)
    k1, k2, k3, k4 = jax.random.split(key, 4)

    # Case 1: small demo shape, in_class=1.
    N, C, H, W = 2, 4, 16, 16
    yhat = jax.random.normal(k1, (N, C, H, W), dtype=jnp.float32)
    y = jax.random.randint(k2, (N, H, W), 0, C, dtype=jnp.int32)

    out = recall_class1(yhat, y, in_class=1, eps=1e-6)
    out = jax.block_until_ready(out)
    ref = _torch_like_reference(yhat, y, in_class=1, eps=1e-6)
    assert abs(float(out) - float(ref)) < 1e-5, (float(out), float(ref))

    # Case 2: in_class == 0 path (all preds become 0 -> TP = FN = sum(y == 0)).
    out0 = jax.block_until_ready(recall_class1(yhat, y, in_class=0, eps=1e-6))
    ref0 = _torch_like_reference(yhat, y, in_class=0, eps=1e-6)
    assert abs(float(out0) - float(ref0)) < 1e-5, (float(out0), float(ref0))

    # Case 3: partial trailing block (rows=18, block_rows=8) exercises the
    # in-kernel tail validity mask.
    N2, C2, H2, W2 = 1, 3, 48, 48
    yhat2 = jax.random.normal(k3, (N2, C2, H2, W2), dtype=jnp.float32)
    y2 = jax.random.randint(k4, (N2, H2, W2), 0, C2, dtype=jnp.int32)
    out2 = jax.block_until_ready(
        recall_class1(yhat2, y2, in_class=1, eps=1e-6, block_rows=8))
    ref2 = _torch_like_reference(yhat2, y2, in_class=1, eps=1e-6)
    assert abs(float(out2) - float(ref2)) < 1e-5, (float(out2), float(ref2))

    print("KERNEL_OK")
</pallas_src>

<mosaic_0001>
module attributes {stable_mosaic.version = 11 : i64} {
  func.func @_recall_counts_kernel(%arg0: i32, %arg1: i32, %arg2: memref<1x4x2x128xf32, #tpu.memory_space<vmem>>, %arg3: memref<1x2x128xi32, #tpu.memory_space<vmem>>, %arg4: memref<1x1x2xi32, #tpu.memory_space<smem>>) attributes {dimension_semantics = [#tpu.dimension_semantics<parallel>, #tpu.dimension_semantics<parallel>], iteration_bounds = array<i64: 2, 1>, scalar_prefetch = 0 : i64, scratch_operands = 0 : i64, tpu.core_type = #tpu.core_type<tc>, window_params = [{transform_indices = @transform_0, window_bounds = array<i64: 1, 4, 2, 128>}, {transform_indices = @transform_1, window_bounds = array<i64: 1, 2, 128>}, {transform_indices = @transform_2, window_bounds = array<i64: 1, 1, 2>}]} {
    %c0 = arith.constant 0 : index
    %c0_0 = arith.constant 0 : index
    %c0_1 = arith.constant 0 : index
    %0 = vector.load %arg3[%c0, %c0_0, %c0_1] : memref<1x2x128xi32, #tpu.memory_space<vmem>>, vector<1x2x128xi32>
    %1 = vector.shape_cast %0 : vector<1x2x128xi32> to vector<2x128xi32>
    %c1_i32 = arith.constant 1 : i32
    %2 = vector.broadcast %c1_i32 : i32 to vector<2x128xi32>
    %3 = arith.cmpi eq, %1, %2 : vector<2x128xi32>
    %4 = arith.extui %3 : vector<2x128xi1> to vector<2x128xi32>
    %5 = vector.shape_cast %4 : vector<2x128xi32> to vector<1x2x128xi32>
    %cst = arith.constant dense<0> : vector<1xi32>
    %6 = vector.multi_reduction <add>, %5, %cst [1, 2] : vector<1x2x128xi32> to vector<1xi32>
    %7 = vector.shape_cast %6 : vector<1xi32> to vector<1x1x1xi32>
    %8 = vector.extract %7[0, 0, 0] : i32 from vector<1x1x1xi32>
    %c0_2 = arith.constant 0 : index
    %c1 = arith.constant 1 : index
    %c0_3 = arith.constant 0 : index
    %c0_4 = arith.constant 0 : index
    %9 = vector.load %arg2[%c0_2, %c1, %c0_3, %c0_4] : memref<1x4x2x128xf32, #tpu.memory_space<vmem>>, vector<1x1x2x128xf32>
    %10 = vector.shape_cast %9 : vector<1x1x2x128xf32> to vector<2x128xf32>
    %c0_5 = arith.constant 0 : index
    %c0_6 = arith.constant 0 : index
    %c0_7 = arith.constant 0 : index
    %c0_8 = arith.constant 0 : index
    %11 = vector.load %arg2[%c0_5, %c0_6, %c0_7, %c0_8] : memref<1x4x2x128xf32, #tpu.memory_space<vmem>>, vector<1x1x2x128xf32>
    %12 = vector.shape_cast %11 : vector<1x1x2x128xf32> to vector<2x128xf32>
    %13 = arith.cmpf ogt, %10, %12 : vector<2x128xf32>
    %c0_9 = arith.constant 0 : index
    %c2 = arith.constant 2 : index
    %c0_10 = arith.constant 0 : index
    %c0_11 = arith.constant 0 : index
    %14 = vector.load %arg2[%c0_9, %c2, %c0_10, %c0_11] : memref<1x4x2x128xf32, #tpu.memory_space<vmem>>, vector<1x1x2x128xf32>
    %15 = vector.shape_cast %14 : vector<1x1x2x128xf32> to vector<2x128xf32>
    %16 = arith.cmpf oge, %10, %15 : vector<2x128xf32>
    %17 = arith.andi %13, %16 : vector<2x128xi1>
    %c0_12 = arith.constant 0 : index
    %c3 = arith.constant 3 : index
    %c0_13 = arith.constant 0 : index
    %c0_14 = arith.constant 0 : index
    %18 = vector.load %arg2[%c0_12, %c3, %c0_13, %c0_14] : memref<1x4x2x128xf32, #tpu.memory_space<vmem>>, vector<1x1x2x128xf32>
    %19 = vector.shape_cast %18 : vector<1x1x2x128xf32> to vector<2x128xf32>
    %20 = arith.cmpf oge, %10, %19 : vector<2x128xf32>
    %21 = arith.andi %17, %20 : vector<2x128xi1>
    %22 = arith.andi %21, %3 : vector<2x128xi1>
    %23 = arith.extui %22 : vector<2x128xi1> to vector<2x128xi32>
    %24 = vector.shape_cast %23 : vector<2x128xi32> to vector<1x2x128xi32>
    %cst_15 = arith.constant dense<0> : vector<1xi32>
    %25 = vector.multi_reduction <add>, %24, %cst_15 [1, 2] : vector<1x2x128xi32> to vector<1xi32>
    %26 = vector.shape_cast %25 : vector<1xi32> to vector<1x1x1xi32>
    %27 = vector.extract %26[0, 0, 0] : i32 from vector<1x1x1xi32>
    %c0_16 = arith.constant 0 : index
    %c0_17 = arith.constant 0 : index
    %c0_18 = arith.constant 0 : index
    %28 = memref.load %arg4[%c0_16, %c0_17, %c0_18] : memref<1x1x2xi32, #tpu.memory_space<smem>>
    memref.store %27, %arg4[%c0_16, %c0_17, %c0_18] : memref<1x1x2xi32, #tpu.memory_space<smem>>
    %c0_19 = arith.constant 0 : index
    %c0_20 = arith.constant 0 : index
    %c1_21 = arith.constant 1 : index
    %29 = memref.load %arg4[%c0_19, %c0_20, %c1_21] : memref<1x1x2xi32, #tpu.memory_space<smem>>
    memref.store %8, %arg4[%c0_19, %c0_20, %c1_21] : memref<1x1x2xi32, #tpu.memory_space<smem>>
    return
  }
  func.func @transform_0(%arg0: i32, %arg1: i32) -> (i32, i32, i32, i32) {
    %c0_i32 = arith.constant 0 : i32
    %c0_i32_0 = arith.constant 0 : i32
    %c0_i32_1 = arith.constant 0 : i32
    return %arg0, %c0_i32, %arg1, %c0_i32_0 : i32, i32, i32, i32
  }
  func.func @transform_1(%arg0: i32, %arg1: i32) -> (i32, i32, i32) {
    %c0_i32 = arith.constant 0 : i32
    %c0_i32_0 = arith.constant 0 : i32
    return %arg0, %arg1, %c0_i32 : i32, i32, i32
  }
  func.func @transform_2(%arg0: i32, %arg1: i32) -> (i32, i32, i32) {
    %c0_i32 = arith.constant 0 : i32
    %c0_i32_0 = arith.constant 0 : i32
    return %arg0, %arg1, %c0_i32 : i32, i32, i32
  }
}

</mosaic_0001>

<bundles_post_ra>
// kernel: tpu_custom_call.1
= control target key start
LH: loop header
LB: loop body
LE: loop exit
PB: predicated region body
PF: predicated region fallthrough
CT: control target
= control target key end

     0   :  { %7 = vsyncpa [#allocation3], 0  ;;  %s789_s0 = inlined_call_operand.hbm [shape: f32[2,4,2,128], index: 0, kind: input, shape index: {}]   ;;  %s790_s1 = inlined_call_operand.hbm [shape: s32[2,2,128], index: 1, kind: input, shape index: {}]   ;;  %s791_s2 = inlined_call_operand.hbm [shape: s32[2,1,2], index: 2, kind: output, shape index: {}]  }
   0x1   :  { %9 = vsyncpa [#allocation3 + $0x1], 0 }
   0x2   :  { %10 = vsyncpa [#allocation6], 0 }
   0x3   :  { %12 = vsyncpa [#allocation6 + $0x1], 0 }
   0x4   :  { %13 = vsyncpa [#allocation4], 0 }
   0x5   :  { %15 = vsyncpa [#allocation4 + $0x1], 0  ;;  %s645_s9 = smov 0   ;;  %s647_s10 = smov 0  }
   0x6   :  { %s649_s11 = smov 0   ;;  %s651_s12 = smov 0  }
   0x7   :  { %s653_s13 = smov 0   ;;  %s655_s14 = smov 0  }
   0x8 LB: > { %s404_s15 = sadd.s32 4294967295, %s625_s14   ;;  %s405_s16 = sadd.s32 4294967294, %s625_s14   ;;  %s625_s14 = sphi %s655_s14, %s21_s14   ;;  %s621_s13 = sphi %s653_s13, %s801_s13   ;;  %s617_s12 = sphi %s651_s12, %s800_s12   ;;  %s613_s11 = sphi %s649_s11, %s799_s11   ;;  %s609_s10 = sphi %s647_s10, %s798_s10   ;;  %s605_s9 = sphi %s645_s9, %s797_s9  }
   0x9   : > { %s33_s17 = sadd.s32 1, %s621_s13  ;;  %s42_s18 = sadd.s32 1, %s613_s11 }
   0xa   : > { %p35_p0 = scmp.ge.s32.totalorder %s33_s17, 2  ;;  %p49_p1 = scmp.ne.s32.totalorder %s613_s11, %s609_s10 }
   0xb   : > { %p50_p2 = scmp.eq.s32.totalorder %s625_s14, 0  ;;  %p55_p3 = scmp.ne.s32.totalorder %s609_s10, %s605_s9 }
   0xc   : > { %s803_s17 = smov (%p35_p0, %s33_s17), 0  ;;  %p56_p5 = scmp.eq.s32.totalorder %s404_s15, 0 }
   0xd   : > { %p686_p4 = por %p50_p2, %p49_p1  ;;  %s37_s20 = ssub.s32 %s621_s13, %s803_s17 }
   0xe   : > { %p109_p6 = scmp.eq.s32.totalorder %s404_s15, 1  ;;  %p40_p7 = scmp.eq.s32.totalorder %s37_s20, 0 }
   0xf   : > { %p692_p8 = por %p56_p5, %p55_p3  ;;  %p115_p10 = scmp.eq.s32.totalorder %s405_s16, 1 }
  0x10   : > { %p696_p9 = por %p109_p6, %p49_p1  ;;  %p441_p12 = scmp.lt.s32.totalorder %s625_s14, 2 }
  0x11   : > { %s701_s23 = scalar_select %p40_p7, %s613_s11, %s42_s18  }
  0x12   : > { %p703_p11 = por %p115_p10, %p55_p3  ;;  %s135_s25 = sand.u32 1, %s613_s11  }
  0x13   : > { %s408_s26 = sshll.u32 %s135_s25, 3  ;;  %s423_s27 = sshll.u32 %s621_s13, 3 }
  0x14   : > { %s145_s30 = scalar_lea.hbm %s789_s0, %s423_s27  ;;  %s139_s3 = scalar_lea.vmem [#allocation2], %s408_s26 }
  0x15   : > { %s148_s4 = sshll.u32 %s139_s3, 4  ;;  %s146_s5 = sshll.u32 %s145_s30, 4  ;;  %s149_s4 = int_to_ptr.vmem [resolvable:$true] %s148_s4  ;;  %s147_s5 = int_to_ptr.hbm [resolvable:$true] %s146_s5 }
  0x16   : > { %p717_p13 = pnand %p441_p12, %p686_p4  ;;  %p413_p0 = scmp.ge.s32.totalorder %s625_s14, 1 }
  0x17   : > { %s136_s7 = scalar_lea.sflag [#allocation3], %s135_s25  ;;  %s627_s8 = smov 32  }
  0x18   : > { %s628_s15 = smov 2   ;;  %p176_p1 = scmp.lt.s32.totalorder %s625_s14, 3 }
  0x19   : > { %437 = dma.hbm_to_vmem [thread:$0]  (!%p717_p13), %s147_s5, 128, %s149_s4, %s136_s7, %s627_s8, %s627_s8, %s628_s15  }
  0x1a   : > { %s411_s16 = sshll.u32 %s135_s25, 1  ;;  %s412_s18 = sshll.u32 %s621_s13, 1 }
  0x1b   : > { %p177_p2 = pnand %p413_p0, %p176_p1  ;;  %s167_s19 = scalar_lea.hbm %s790_s1, %s412_s18 }
  0x1c   : > { %s162_s27 = scalar_lea.vmem [#allocation5], %s411_s16  ;;  %s169_s29 = sshll.u32 %s167_s19, 4  ;;  %s170_s29 = int_to_ptr.hbm [resolvable:$true] %s169_s29 }
  0x1d   : > { %s171_s28 = sshll.u32 %s162_s27, 4  ;;  %s159_s30 = scalar_lea.sflag [#allocation6], %s135_s25  ;;  %s172_s28 = int_to_ptr.vmem [resolvable:$true] %s171_s28 }
  0x1e   : > { %440 = dma.hbm_to_vmem [thread:$0]  (!%p717_p13), %s170_s29, 32, %s172_s28, %s159_s30  }
  0x1f   : > { %180 = sbr.rel (%p177_p2) target bundleno = 243 (0xf3), region = 28  ;;  %s732_s3 = sand.u32 (!%p177_p2), 1, %s609_s10  }
  0x20   : > { %s414_s4 = sshll.u32 (!%p177_p2), %s732_s3, 3  ;;  %s183_s5 = scalar_lea.sflag (!%p177_p2), [#allocation3], %s732_s3 }
  0x21   : > { %s186_s7 = scalar_lea.vmem (!%p177_p2), [#allocation2], %s414_s4 }
  0x24   : > { %592 = dma.done.wait (%p692_p8), %s183_s5, 128  }
  0x25   : > { %594 = vsyncadd (%p692_p8), %s183_s5, 4294967168  ;;  %s415_s25 = sshll.u32 %s732_s3, 1  ;;  %s193_s6 = scalar_lea.sflag [#allocation6], %s732_s3 }
  0x26   : > { %s196_s8 = scalar_lea.vmem [#allocation5], %s415_s25 }
  0x27   : > { %596 = dma.done.wait (%p692_p8), %s193_s6, 32  }
  0x28   : > { %598 = vsyncadd (%p692_p8), %s193_s6, 4294967264  ;;  %vm226_vm0 = vcmask 1041408   ;;  %v223_v0 = vld [vmem:[%s196_s8] sm:$0x3]  ;;  %v417_v1 = vld [vmem:[%s186_s7 + $0x2] sm:$0x3]  ;;  %s296_s19 = scalar_lea.hbm %s791_s2, %s617_s12 }
  0x29   : > { %v249_v2 = vld [vmem:[%s186_s7] sm:$0x3]  ;;  %vm224_vm1 = vcmp.eq.s32.totalorder %v223_v0, 1  ;;  %v418_v3 = vld [vmem:[%s186_s7 + $0x4] sm:$0x3]  ;;  %v629_v5 = vmov 0  }
  0x2a   : > { %vm250_vm2 = vcmp.gt.f32.partialorder %v417_v1, %v249_v2  ;;  %v419_v4 = vld [vmem:[%s186_s7 + $0x6] sm:$0x3]  ;;  %v225_v6 = vsel %vm224_vm1, 1, %v629_v5  ;;  %vm253_vm3 = vcmp.ge.f32.partialorder %v417_v1, %v418_v3  ;;  %s416_s21 = sshll.u32 %s732_s3, 7  ;;  %s298_s27 = sshll.u32 %s296_s19, 4  ;;  %s299_s27 = int_to_ptr.hbm [resolvable:$true] %s298_s27 }
  0x2b   : > { %vm257_vm4 = vcmp.ge.f32.partialorder %v417_v1, %v419_v4  ;;  %v227_v7 = vsel %vm226_vm0, %v225_v6, 0  ;;  %vm254_vm5 = vmand %vm250_vm2, %vm253_vm3  ;;  %s222_s15 = scalar_lea.smem [#allocation7], %s416_s21  ;;  %s286_s29 = scalar_lea.sflag [#allocation4], %s732_s3 }
  0x2c   : > { %v229_v8 = vshrl.u32 %v227_v7, 16  ;;  %vm258_vm6 = vmand %vm254_vm5, %vm257_vm4  ;;  %v228_v9 = vand.u32 65535, %v227_v7  ;;  %s283_s16 = scalar_lea.smem %s222_s15, 1 [#allocation7]  ;;  %s553_s30 = sshra.s32 %s299_s27, 4  ;;  %s554_s30 = int_to_ptr.hbm [resolvable:$true] %s553_s30 }
  0x2d   : > { %vm259_vm7 = vmand %vm258_vm6, %vm224_vm1  ;;  %s555_s4 = scalar_lea.hbm %s554_s30, 1  ;;  %s559_s25 = scalar_lea.hbm %s791_s2, 2 }
  0x2e   : > { %v231_v10 = vcvt.s32.f32 %v229_v8  ;;  %v230_v11 = vcvt.s32.f32 %v228_v9  ;;  %v260_v12 = vsel %vm259_vm7, 1, %v629_v5  ;;  %p556_p3 = scmp.ne.s32.totalorder %s554_s30, %s555_s4  ;;  %p560_p6 = scmp.lt.s32.totalorder %s554_s30, %s791_s2 }
  0x2f   : > { %v261_v13 = vsel %vm226_vm0, %v260_v12, 0  ;;  %p561_p7 = scmp.lt.s32.totalorder %s559_s25, %s555_s4 }
  0x30   : > { %234 = vadd.xlane.f32.xlu0 %v231_v10  ;;  %232 = vadd.xlane.f32.xlu1 %v230_v11  ;;  %v263_v14 = vshrl.u32 %v261_v13, 16  ;;  %v262_v15 = vand.u32 65535, %v261_v13  ;;  %p557_p4 = pnand %p556_p3, %p696_p9 }
  0x31   : > { %p562_p8 = por %p561_p7, %p560_p6 }
  0x32   : > { %v265_v16 = vcvt.s32.f32 %v263_v14  ;;  %v264_v17 = vcvt.s32.f32 %v262_v15  ;;  %p558_p5 = pneg %p557_p4 }
  0x34   : > { %p563_p10 = pnand %p562_p8, %p558_p5 }
  0x38   : > { %268 = vadd.xlane.f32.xlu0 %v265_v16  ;;  %266 = vadd.xlane.f32.xlu1 %v264_v17 }
  0xa3   : > { %v235_v18 = vpop.xlane.xlu0 %234  ;;  %v233_v19 = vpop.xlane.xlu1 %232 }
  0xa4   : > { %v237_v20 = vcvt.f32.s32 %v235_v18  ;;  %v236_v21 = vcvt.f32.s32 %v233_v19 }
  0xa6   : > { %v238_v22 = vshll.u32 %v237_v20, 16 }
  0xa8   : > { %v239_v23 = vadd.s32 %v238_v22, %v236_v21 }
  0xaa   : > { %v240_v24 = vrot.slane %v239_v23, 4 }
  0xab   : > { %v269_v25 = vpop.xlane.xlu0 %268  ;;  %v267_v26 = vpop.xlane.xlu1 %266 }
  0xac   : > { %v271_v27 = vcvt.f32.s32 %v269_v25  ;;  %v270_v28 = vcvt.f32.s32 %v267_v26  ;;  %v241_v29 = vadd.s32 %v240_v24, %v239_v23 }
  0xae   : > { %v272_v30 = vshll.u32 %v271_v27, 16  ;;  %v242_v31 = vrot.slane %v241_v29, 2 }
  0xb0   : > { %v273_v32 = vadd.s32 %v272_v30, %v270_v28  ;;  %v243_v33 = vadd.s32 %v242_v31, %v241_v29 }
  0xb2   : > { %v274_v34 = vrot.slane %v273_v32, 4  ;;  %v244_v35 = vrot.slane %v243_v33, 1 }
  0xb4   : > { %v275_v36 = vadd.s32 %v274_v34, %v273_v32  ;;  %v245_v37 = vadd.s32 %v244_v35, %v243_v33 }
  0xb6   : > { %424 = vpush %v245_v37  ;;  %v276_v38 = vrot.slane %v275_v36, 2 }
  0xb8   : > { %v277_v39 = vadd.s32 %v276_v38, %v275_v36 }
  0xba   : > { %v278_v40 = vrot.slane %v277_v39, 1 }
  0xbc   : > { %v279_v41 = vadd.s32 %v278_v40, %v277_v39 }
  0xbe   : > { %426 = vpush %v279_v41 }
  0xe7   : > { %s425_s18 = spop %424 }
  0xe8   : > { %284 = sst [smem:[%s283_s16]] %s425_s18 }
  0xef   : > { %s427_s28 = spop %426 }
  0xf0   : > { %282 = sst [smem:[%s222_s15]] %s427_s28 }
  0xf1   : > { %566 = shalt.err (!%p563_p10)
}
  0xf2   : > { %432 = dma.smem_to_hbm (%p696_p9), %s222_s15, 16, %s299_s27, %s286_s29  }
  0xf3 PF: > { %305 = sbr.rel (%p441_p12) target bundleno = 251 (0xfb), region = 44  ;;  %s310_s12 = sand.u32 (!%p441_p12), 1, %s605_s9  }
  0xf4   : > { %s311_s3 = scalar_lea.sflag (!%p441_p12), [#allocation4], %s310_s12 }
  0xf8   : > { %600 = dma.done.wait (%p703_p11), %s311_s3, 16  }
  0xf9   : > { %602 = vsyncadd (%p703_p11), %s311_s3, 4294967280 }
  0xfa   : > { %317 = sfence }
  0xfb PF: > { %s21_s14 = sadd.s32 1, %s625_s14   ;;  %s797_s9 = smov %s609_s10 }
  0xfc   : > { %p18_p13 = scmp.ge.s32.totalorder %s21_s14, 4   ;;  %s798_s10 = smov %s613_s11 }
  0xfd   : > { %s799_s11 = smov %s701_s23  ;;  %s800_s12 = smov %s621_s13 }
  0xfe   : > { %s801_s13 = smov %s803_s17  ;;  %20 = sbr.rel (!%p18_p13) target bundleno = 8 (0x8), region = 91 }
 0x103   :  { %318 = vsyncpa [#allocation3], 1 }
 0x104   :  { %320 = vsyncpa [#allocation3 + $0x1], 1 }
 0x105   :  { %321 = vsyncpa [#allocation6], 1 }
 0x106   :  { %323 = vsyncpa [#allocation6 + $0x1], 1 }
 0x107   :  { %324 = vsyncpa [#allocation4], 1 }
 0x108   :  { %326 = vsyncpa [#allocation4 + $0x1], 1 }

</bundles_post_ra>
